<compile_context>
chip_gen: v7x
topology: tpu7x:2x2x1
jax: 0.10.0
libtpu: 0.0.40
codegen_flags: <defaults>
</compile_context>

<pallas_src>
import functools
import math

import jax
import jax.numpy as jnp
from jax import lax
from jax.experimental import pallas as pl
from jax.experimental.pallas import tpu as pltpu

LANE = 128
BBOX_XFORM_CLIP = math.log(1000.0 / 16.0)   # torchvision clamp on dw/dh


def _round_up(x, m):
    return (x + m - 1) // m * m


# ---------------------------------------------------------------------------
# Gridded kernel: FastRCNNPredictor head, fully fused per ROI-row tile
#   y              = bf16(x_tile) @ [W_cls | W_bbox | 0] + [b_cls | b_bbox | 0]
#   score          = max_{fg classes} softmax(cls_logits)
#   label          = argmax_{fg classes} softmax(cls_logits)   (1..C)
#   out row layout = [score | label | (unused) | bbox deltas @ cols c1..5c1 | 0]
# ---------------------------------------------------------------------------
def frcnn_head_kernel(x_ref, w_ref, b_ref, out_ref, *, c1, out_w):
    # in-kernel bf16 cast of x (f32 in HBM), f32 MXU accumulation
    x = x_ref[...].astype(jnp.bfloat16)
    y = jnp.dot(x, w_ref[...], preferred_element_type=jnp.float32)
    y = y + b_ref[...]                                      # (TM, OUT_W) f32

    # single lane-iota reused for every mask
    col = lax.broadcasted_iota(jnp.int32, y.shape, 1)
    is_cls = col < c1
    is_fg = is_cls & (col >= 1)
    is_delta = jnp.logical_not(is_cls) & (col < 5 * c1)

    # numerically-stable softmax over the class lanes; only the max foreground
    # probability (score) and its lane index (label) are needed downstream.
    y_cls = jnp.where(is_cls, y, -jnp.inf)
    m_row = jnp.max(y_cls, axis=-1, keepdims=True)
    e = jnp.exp(y_cls - m_row)                              # 0 outside class lanes
    denom = jnp.sum(e, axis=-1, keepdims=True)              # (TM, 1)

    e_fg = jnp.where(is_fg, e, -1.0)                        # probs > 0 for fg
    e_max = jnp.max(e_fg, axis=-1, keepdims=True)           # (TM, 1)
    score = e_max / denom                                   # exact; (TM,1) only
    label = jnp.min(jnp.where(e_fg == e_max, col, out_w),   # first argmax
                    axis=-1, keepdims=True).astype(jnp.float32)

    # lane-dense packed output -> one unmasked 128-lane store per row tile
    out_ref[...] = jnp.where(col == 0, score,
                             jnp.where(col == 1, label,
                                       jnp.where(is_delta, y, 0.0)))


def fuse_predictor_params(w_cls, b_cls, w_bbox, b_bbox):
    """Build the fused, lane-padded head parameters ONCE (outside the per-call
    jit path): W (D, OUT_W) bf16, b (1, OUT_W) f32 with layout [cls|bbox|0]."""
    d, c1 = w_cls.shape
    out_w = _round_up(5 * c1, LANE)
    w = jnp.concatenate([w_cls, w_bbox], axis=1)                    # (d, 5*c1)
    w = jnp.pad(w, ((0, 0), (0, out_w - 5 * c1))).astype(jnp.bfloat16)
    b = jnp.concatenate([b_cls, b_bbox])                            # (5*c1,)
    b = jnp.pad(b, (0, out_w - 5 * c1)).astype(jnp.float32).reshape(1, out_w)
    return w, b


def frcnn_head(x, w_fused, b_fused, c1):
    """Returns packed head output (N, OUT_W) f32:
       col 0 = score, col 1 = label (as f32), cols c1..5*c1 = bbox deltas."""
    n, d = x.shape
    out_w = w_fused.shape[1]

    # row tile: 128 rows at realistic scale, shrink (8-aligned) for tiny N
    tm = min(128, _round_up(n, 8))
    grid = (pl.cdiv(n, tm),)

    cost = pl.CostEstimate(
        flops=2 * n * d * out_w,
        transcendentals=n * c1,
        bytes_accessed=n * d * 4 + d * out_w * 2 + out_w * 4 + n * out_w * 4)

    return pl.pallas_call(
        functools.partial(frcnn_head_kernel, c1=c1, out_w=out_w),
        out_shape=jax.ShapeDtypeStruct((n, out_w), jnp.float32),
        grid_spec=pltpu.PrefetchScalarGridSpec(
            num_scalar_prefetch=0,
            grid=grid,
            in_specs=[pl.BlockSpec((tm, d), lambda i: (i, 0)),       # x row tile
                      pl.BlockSpec((d, out_w), lambda i: (0, 0)),    # fused W (resident)
                      pl.BlockSpec((1, out_w), lambda i: (0, 0))],   # fused bias
            out_specs=pl.BlockSpec((tm, out_w), lambda i: (i, 0))),
        compiler_params=pltpu.CompilerParams(
            dimension_semantics=("parallel",),        # megacore shard on v7x
            vmem_limit_bytes=32 * 1024 * 1024),       # tiled working set << 16 MiB v5e default
        cost_estimate=cost,
    )(x, w_fused, b_fused)


# ---------------------------------------------------------------------------
# Plain-JAX glue reproducing the eval-path semantics around the kernel
# ---------------------------------------------------------------------------
def decode_boxes(proposals, deltas, labels):
    """Faster R-CNN box decoding (weights 10,10,5,5) for the predicted class,
    with torchvision's clamp on dw/dh."""
    n, c4 = deltas.shape
    c1 = c4 // 4
    d = deltas.reshape(n, c1, 4)
    d = jnp.take_along_axis(d, labels.reshape(n, 1, 1), axis=1)[:, 0, :]
    wx, wy, ww, wh = 10.0, 10.0, 5.0, 5.0
    widths = proposals[:, 2] - proposals[:, 0]
    heights = proposals[:, 3] - proposals[:, 1]
    ctr_x = proposals[:, 0] + 0.5 * widths
    ctr_y = proposals[:, 1] + 0.5 * heights
    dx, dy = d[:, 0] / wx, d[:, 1] / wy
    dw = jnp.minimum(d[:, 2] / ww, BBOX_XFORM_CLIP)
    dh = jnp.minimum(d[:, 3] / wh, BBOX_XFORM_CLIP)
    pred_ctr_x = dx * widths + ctr_x
    pred_ctr_y = dy * heights + ctr_y
    pred_w = jnp.exp(dw) * widths
    pred_h = jnp.exp(dh) * heights
    return jnp.stack([pred_ctr_x - 0.5 * pred_w, pred_ctr_y - 0.5 * pred_h,
                      pred_ctr_x + 0.5 * pred_w, pred_ctr_y + 0.5 * pred_h], axis=1)


@functools.partial(jax.jit, static_argnames=("c1", "ks"))
def model_eval_forward(roi_feats, proposals, w_fused, b_fused, c1,
                       ks=(25, 50, 100)):
    """Eval branch of Model.forward:
       detector head -> boxes.int(), labels-1, scores -> pairwise top-K rels.
       # TODO(synk): torchvision's score threshold + per-class NMS before
       # pairing are not reproduced; every ROI is a pairing candidate here.
    """
    # --- fused box_predictor head (single gridded Pallas call) -------------
    out = frcnn_head(roi_feats, w_fused, b_fused, c1)
    det_scores = out[:, 0]                                   # max fg prob
    det_labels = out[:, 1].astype(jnp.int32)                 # 1..C (torchvision)
    deltas = out[:, c1:5 * c1]

    boxes = decode_boxes(proposals, deltas, det_labels)
    bboxes = boxes.astype(jnp.int32)            # dets['boxes'].int()
    bcats = det_labels - 1                      # dets['labels'] - 1
    bscores = det_scores                        # dets['scores']

    # --- pairwise_pbboxes via algebraic reduction --------------------------
    # Ranking ordered pairs (i, j), i != j, by s_i * s_j is monotone in each
    # factor, so the top-kmax pairs live among the ordered pairs of the
    # top-(kmax+1) scored detections (tie ordering differs from torch argsort,
    # as before).  Only (kmax+1)^2 candidate products are ever materialized.
    n = roi_feats.shape[0]
    kmax = max(ks)
    m = min(kmax + 1, n)
    top_s, top_i = lax.top_k(bscores, m)                     # (m,)
    prod = top_s[:, None] * top_s[None, :]                   # (m, m)
    prod = jnp.where(jnp.eye(m, dtype=bool), jnp.float32(-1.0), prod)  # no self pairs
    k_eff = min(kmax, m * m)
    _, flat = lax.top_k(prod.reshape(-1), k_eff)
    if k_eff < kmax:
        # TODO(synk): fewer than kmax ordered pairs exist (tiny N); repeat the
        # best pair to keep static shapes (reference pairwise_pbboxes behavior
        # for this corner is unknown).
        flat = jnp.concatenate(
            [flat, jnp.broadcast_to(flat[:1], (kmax - k_eff,))])
    si = top_i[flat // m]                                    # subject detection idx
    oi = top_i[flat % m]                                     # object detection idx

    sb, ob = bboxes[si], bboxes[oi]
    sc, oc = bcats[si], bcats[oi]
    pb = jnp.concatenate([jnp.minimum(sb[:, :2], ob[:, :2]),
                          jnp.maximum(sb[:, 2:], ob[:, 2:])], axis=1)
    pc = jnp.zeros_like(sc)                                  # torch.zeros_like(scats)

    topk_relationships = []
    for k in ks:
        topk_relationships.append(
            dict(sbboxes=sb[:k], scats=sc[:k], pbboxes=pb[:k],
                 pcats=pc[:k], obboxes=ob[:k], ocats=oc[:k]))
    return dict(boxes=bboxes, labels=bcats, scores=bscores), topk_relationships


# ---------------------------------------------------------------------------
if __name__ == "__main__":
    key = jax.random.PRNGKey(0)
    k_feat, k_prop, k_wc, k_bc, k_wb, k_bb = jax.random.split(key, 6)

    N_ROIS = 8            # detections_per_img (small)
    IN_FEATURES = 32      # FastRCNNPredictor in_features (small stand-in for 1024)
    NUM_OBJ_CLASSES = 4   # cfg.MODEL.NUM_OBJ_CLASSES
    C1 = NUM_OBJ_CLASSES + 1

    roi_feats = jax.random.normal(k_feat, (N_ROIS, IN_FEATURES), jnp.float32)

    # proposal boxes (x1, y1, x2, y2) in a 64x64 image
    xy = jax.random.uniform(k_prop, (N_ROIS, 2), jnp.float32, 0.0, 40.0)
    wh = jax.random.uniform(k_prop, (N_ROIS, 2), jnp.float32, 8.0, 24.0)
    proposals = jnp.concatenate([xy, xy + wh], axis=1)

    # deterministic FastRCNNPredictor parameters
    w_cls = 0.05 * jax.random.normal(k_wc, (IN_FEATURES, C1), jnp.float32)
    b_cls = 0.01 * jax.random.normal(k_bc, (C1,), jnp.float32)
    w_bbox = 0.05 * jax.random.normal(k_wb, (IN_FEATURES, 4 * C1), jnp.float32)
    b_bbox = 0.01 * jax.random.normal(k_bb, (4 * C1,), jnp.float32)

    # fuse + pad head parameters ONCE, outside the per-call jit path
    w_fused, b_fused = jax.block_until_ready(
        fuse_predictor_params(w_cls, b_cls, w_bbox, b_bbox))

    detections, topk_rels = model_eval_forward(
        roi_feats, proposals, w_fused, b_fused, c1=C1, ks=(4, 8, 16))
    jax.block_until_ready((detections, topk_rels))

    assert detections["boxes"].shape == (N_ROIS, 4)
    assert detections["labels"].shape == (N_ROIS,)
    assert detections["scores"].shape == (N_ROIS,)
    assert topk_rels[0]["sbboxes"].shape == (4, 4)
    assert topk_rels[1]["ocats"].shape == (8,)
    assert topk_rels[2]["pbboxes"].shape == (16, 4)
    print("KERNEL_OK")
</pallas_src>

<mosaic_0001>
module attributes {stable_mosaic.version = 11 : i64} {
  func.func @frcnn_head_kernel(%arg0: i32, %arg1: memref<8x32xf32, #tpu.memory_space<vmem>>, %arg2: memref<32x128xbf16, #tpu.memory_space<vmem>>, %arg3: memref<1x128xf32, #tpu.memory_space<vmem>>, %arg4: memref<8x128xf32, #tpu.memory_space<vmem>>) attributes {dimension_semantics = [#tpu.dimension_semantics<parallel>], iteration_bounds = array<i64: 1>, scalar_prefetch = 0 : i64, scratch_operands = 0 : i64, tpu.core_type = #tpu.core_type<tc>, window_params = [{transform_indices = @transform_0, window_bounds = array<i64: 8, 32>}, {pipeline_mode = #tpu.pipeline_mode<synchronous>, transform_indices = @transform_1, window_bounds = array<i64: 32, 128>}, {pipeline_mode = #tpu.pipeline_mode<synchronous>, transform_indices = @transform_2, window_bounds = array<i64: 1, 128>}, {transform_indices = @transform_3, window_bounds = array<i64: 8, 128>}]} {
    %c0 = arith.constant 0 : index
    %c0_0 = arith.constant 0 : index
    %0 = vector.load %arg1[%c0, %c0_0] : memref<8x32xf32, #tpu.memory_space<vmem>>, vector<8x32xf32>
    %1 = arith.truncf %0 : vector<8x32xf32> to vector<8x32xbf16>
    %c0_1 = arith.constant 0 : index
    %c0_2 = arith.constant 0 : index
    %2 = vector.load %arg2[%c0_1, %c0_2] : memref<32x128xbf16, #tpu.memory_space<vmem>>, vector<32x128xbf16>
    %cst = arith.constant dense<0.000000e+00> : vector<8x128xf32>
    %3 = tpu.matmul %1, %2, %cst {dimension_numbers = #tpu.dot_dimension_numbers<[1], [0], [0], [1], [0, 0, 1, 1], [], []>} : vector<8x32xbf16>, vector<32x128xbf16>, vector<8x128xf32> -> vector<8x128xf32>
    %c0_3 = arith.constant 0 : index
    %c0_4 = arith.constant 0 : index
    %4 = vector.load %arg3[%c0_3, %c0_4] : memref<1x128xf32, #tpu.memory_space<vmem>>, vector<1x128xf32>
    %5 = vector.broadcast %4 : vector<1x128xf32> to vector<8x128xf32>
    %6 = arith.addf %3, %5 : vector<8x128xf32>
    %7 = tpu.iota {dimensions = array<i32: 1>} : vector<8x128xi32>
    %c5_i32 = arith.constant 5 : i32
    %8 = vector.broadcast %c5_i32 : i32 to vector<8x128xi32>
    %9 = arith.cmpi slt, %7, %8 : vector<8x128xi32>
    %c1_i32 = arith.constant 1 : i32
    %10 = vector.broadcast %c1_i32 : i32 to vector<8x128xi32>
    %11 = arith.cmpi sge, %7, %10 : vector<8x128xi32>
    %12 = arith.andi %9, %11 : vector<8x128xi1>
    %cst_5 = arith.constant dense<true> : vector<8x128xi1>
    %13 = arith.xori %9, %cst_5 : vector<8x128xi1>
    %c25_i32 = arith.constant 25 : i32
    %14 = vector.broadcast %c25_i32 : i32 to vector<8x128xi32>
    %15 = arith.cmpi slt, %7, %14 : vector<8x128xi32>
    %16 = arith.andi %13, %15 : vector<8x128xi1>
    %cst_6 = arith.constant 0xFF800000 : f32
    %17 = vector.broadcast %cst_6 : f32 to vector<8x128xf32>
    %18 = arith.select %9, %6, %17 : vector<8x128xi1>, vector<8x128xf32>
    %cst_7 = arith.constant dense<0xFF800000> : vector<8xf32>
    %19 = vector.multi_reduction <maximumf>, %18, %cst_7 [1] : vector<8x128xf32> to vector<8xf32>
    %20 = vector.shape_cast %19 : vector<8xf32> to vector<8x1xf32>
    %21 = vector.broadcast %20 : vector<8x1xf32> to vector<8x128xf32>
    %22 = arith.subf %18, %21 : vector<8x128xf32>
    %23 = math.exp %22 : vector<8x128xf32>
    %cst_8 = arith.constant dense<0.000000e+00> : vector<8xf32>
    %24 = vector.multi_reduction <add>, %23, %cst_8 [1] : vector<8x128xf32> to vector<8xf32>
    %25 = vector.shape_cast %24 : vector<8xf32> to vector<8x1xf32>
    %cst_9 = arith.constant -1.000000e+00 : f32
    %26 = vector.broadcast %cst_9 : f32 to vector<8x128xf32>
    %27 = arith.select %12, %23, %26 : vector<8x128xi1>, vector<8x128xf32>
    %cst_10 = arith.constant dense<0xFF800000> : vector<8xf32>
    %28 = vector.multi_reduction <maximumf>, %27, %cst_10 [1] : vector<8x128xf32> to vector<8xf32>
    %29 = vector.shape_cast %28 : vector<8xf32> to vector<8x1xf32>
    %30 = arith.divf %29, %25 : vector<8x1xf32>
    %31 = vector.broadcast %29 : vector<8x1xf32> to vector<8x128xf32>
    %32 = arith.cmpf oeq, %27, %31 : vector<8x128xf32>
    %c128_i32 = arith.constant 128 : i32
    %33 = vector.broadcast %c128_i32 : i32 to vector<8x128xi32>
    %34 = arith.select %32, %7, %33 : vector<8x128xi1>, vector<8x128xi32>
    %cst_11 = arith.constant dense<2147483647> : vector<8xi32>
    %35 = vector.multi_reduction <minsi>, %34, %cst_11 [1] : vector<8x128xi32> to vector<8xi32>
    %36 = vector.shape_cast %35 : vector<8xi32> to vector<8x1xi32>
    %37 = arith.sitofp %36 : vector<8x1xi32> to vector<8x1xf32>
    %c0_i32 = arith.constant 0 : i32
    %38 = vector.broadcast %c0_i32 : i32 to vector<8x128xi32>
    %39 = arith.cmpi eq, %7, %38 : vector<8x128xi32>
    %c1_i32_12 = arith.constant 1 : i32
    %40 = vector.broadcast %c1_i32_12 : i32 to vector<8x128xi32>
    %41 = arith.cmpi eq, %7, %40 : vector<8x128xi32>
    %cst_13 = arith.constant 0.000000e+00 : f32
    %42 = vector.broadcast %cst_13 : f32 to vector<8x128xf32>
    %43 = arith.select %16, %6, %42 : vector<8x128xi1>, vector<8x128xf32>
    %44 = vector.shape_cast %37 : vector<8x1xf32> to vector<8x1xf32>
    %45 = vector.broadcast %44 : vector<8x1xf32> to vector<8x128xf32>
    %46 = arith.select %41, %45, %43 : vector<8x128xi1>, vector<8x128xf32>
    %47 = vector.shape_cast %30 : vector<8x1xf32> to vector<8x1xf32>
    %48 = vector.broadcast %47 : vector<8x1xf32> to vector<8x128xf32>
    %49 = arith.select %39, %48, %46 : vector<8x128xi1>, vector<8x128xf32>
    %c0_14 = arith.constant 0 : index
    %c0_15 = arith.constant 0 : index
    %50 = vector.load %arg4[%c0_14, %c0_15] : memref<8x128xf32, #tpu.memory_space<vmem>>, vector<8x128xf32>
    tpu.vector_store %arg4[%c0_14, %c0_15], %49 {strides = array<i32>} : memref<8x128xf32, #tpu.memory_space<vmem>>, vector<8x128xf32>,
    return
  }
  func.func @transform_0(%arg0: i32) -> (i32, i32) {
    %c0_i32 = arith.constant 0 : i32
    %c0_i32_0 = arith.constant 0 : i32
    return %arg0, %c0_i32 : i32, i32
  }
  func.func @transform_1(%arg0: i32) -> (i32, i32) {
    %c0_i32 = arith.constant 0 : i32
    %c0_i32_0 = arith.constant 0 : i32
    %c0_i32_1 = arith.constant 0 : i32
    return %c0_i32, %c0_i32_0 : i32, i32
  }
  func.func @transform_2(%arg0: i32) -> (i32, i32) {
    %c0_i32 = arith.constant 0 : i32
    %c0_i32_0 = arith.constant 0 : i32
    %c0_i32_1 = arith.constant 0 : i32
    return %c0_i32, %c0_i32_0 : i32, i32
  }
  func.func @transform_3(%arg0: i32) -> (i32, i32) {
    %c0_i32 = arith.constant 0 : i32
    %c0_i32_0 = arith.constant 0 : i32
    return %arg0, %c0_i32 : i32, i32
  }
}

</mosaic_0001>

<bundles_post_ra>
// kernel: model_eval_forward.1
= control target key start
LH: loop header
LB: loop body
LE: loop exit
PB: predicated region body
PF: predicated region fallthrough
CT: control target
= control target key end

     0   :  { %v156_v0 = vmov 0.0   ;;  %vm157_vm0 = vmmov 0   ;;  %vm40_vm1 = vcmask 261120   ;;  %v84_v5 = vlaneseq  ;;  %s197_s1 = inlined_call_operand.vmem [shape: bf16[32,128], index: 1, kind: input, shape index: {}]   ;;  %s198_s0 = inlined_call_operand.vmem [shape: f32[8,32], index: 0, kind: input, shape index: {}]   ;;  %s199_s2 = inlined_call_operand.vmem [shape: f32[1,128], index: 2, kind: input, shape index: {}]   ;;  %s200_s3 = inlined_call_operand.vmem [shape: f32[8,128], index: 3, kind: output, shape index: {}]  }
   0x1   :  { %139 = vmatprep.subr.bf16.mxu0 %v156_v0  ;;  %v150_v1 = vld [vmem:[%s197_s1] sm:$0xff]   ;;  %143 = vmatprep.mubr.msk.bf16.mxu0 %vm157_vm0, %v156_v0  ;;  %v151_v2 = vld [vmem:[%s197_s1 + $0x8] sm:$0xff]   ;;  %vm158_vm7 = vmmov 1  }
   0x2   :  { %140 = vmatpush3.bf16.msra.mxu0 %v150_v1  ;;  %v15_v3 = vld [vmem:[%s198_s0] sm:$0xff]  ;;  %v85_v7 = vand.u32 127, %v84_v5 }
   0x3   :  { %141 = vmatprep.subr.bf16.mxu0 %v156_v0  ;;  %v16_v4 = vpack.c.bf16 %v15_v3, %v15_v3  ;;  %v132_v6 = vld [vmem:[%s199_s2] ss:$0 sm:$0xff] }
   0x4   :  { %vm86_vm2 = vcmp.lt.s32.totalorder %v85_v7, 5  ;;  %vm87_vm3 = vcmp.ge.s32.totalorder %v85_v7, 1  ;;  %vm90_vm9 = vcmp.lt.s32.totalorder %v85_v7, 25  ;;  %vm123_vm11 = vcmp.eq.s32.totalorder %v85_v7, 1 }
   0x5   :  { %vm88_vm4 = vmand %vm86_vm2, %vm87_vm3  ;;  %vm122_vm12 = vcmp.eq.s32.totalorder %v85_v7, 0 }
   0x6   :  { %142 = vmatpush3.bf16.msra.mxu0 %v151_v2  ;;  %vm89_vm8 = vmxor %vm86_vm2, %vm158_vm7 }
   0x7   :  { %vm91_vm10 = vmand %vm89_vm8, %vm90_vm9 }
   0x9   :  { %144 = vmatmul.mubr.msk.bf16.vlgmr.msra.gmra.mrb[0].mxu0 %vm40_vm1, %v16_v4 }
  0xdc   :  { %v78_v8 = vpop.f32.mrb[0].mxu0 }
  0xdd   :  { %v79_v9 = vadd.f32 %v132_v6, %v78_v8  ;;  %v145_v10 = vpop.f32.mrb[1].mxu0 }
  0xde   :  { %v81_v11 = vpop.f32.mrb[2].mxu0 }
  0xdf   :  { %v146_v12 = vpop.f32.mrb[3].mxu0  ;;  %v92_v13 = vsel %vm86_vm2, %v79_v9, -inf  ;;  %v124_v35 = vsel %vm91_vm10, %v79_v9, 0.0 }
  0xe0   :  { %93 = vmax.xlane.f32.xlu0 %v92_v13 }
 0x16d   :  { %v94_v14 = vpop.xlane.xlu0 %93 }
 0x16e   :  { %v95_v15 = vsub.f32 %v92_v13, %v94_v14 }
 0x170   :  { %v96_v16 = vmul.f32 1.442695, %v95_v15 }
 0x172   :  { %152 = vpow2.f32 %v96_v16 }
 0x17c   :  { %v153_v17 = vpop.eup %152 }
 0x17d   :  { %v100_v18 = vsel %vm88_vm4, %v153_v17, -1.0 }
 0x17e   :  { %101 = vmax.xlane.f32.xlu0 %v100_v18 }
 0x20b   :  { %v102_v19 = vpop.xlane.xlu0 %101 }
 0x20c   :  { %vm105_vm5 = vcmp.eq.f32.partialorder %v100_v18, %v102_v19 }
 0x20d   :  { %v106_v20 = vsel %vm105_vm5, %v85_v7, 128 }
 0x20e   :  { %v108_v21 = vshra.s32 %v106_v20, 16  ;;  %v107_v23 = vand.u32 65535, %v106_v20 }
 0x210   :  { %v110_v22 = vcvt.s32.f32 %v108_v21  ;;  %v109_v25 = vcvt.s32.f32 %v107_v23 }
 0x212   :  { %111 = vmin.xlane.f32.xlu1 %v110_v22 }
 0x216   :  { %98 = vadd.xlane.f32.xlu1 %v153_v17 }
 0x29f   :  { %v112_v24 = vpop.xlane.xlu1 %111 }
 0x2a0   :  { %vm113_vm6 = vcmp.eq.f32.partialorder %v110_v22, %v112_v24  ;;  %v118_v28 = vcvt.f32.s32 %v112_v24 }
 0x2a1   :  { %v114_v26 = vsel %vm113_vm6, %v109_v25, inf }
 0x2a2   :  { %115 = vmin.xlane.f32.xlu0 %v114_v26  ;;  %v119_v30 = vshll.u32 %v118_v28, 16 }
 0x2a3   :  { %v99_v27 = vpop.xlane.xlu1 %98 }
 0x2a4   :  { %154 = vrcp.f32 %v99_v27 }
 0x2ae   :  { %v155_v32 = vpop.eup %154 }
 0x2af   :  { %v104_v36 = vmul.f32 %v155_v32, %v102_v19 }
 0x32f   :  { %v116_v29 = vpop.xlane.xlu0 %115 }
 0x330   :  { %v117_v31 = vcvt.f32.s32 %v116_v29 }
 0x332   :  { %v120_v33 = vadd.s32 %v119_v30, %v117_v31 }
 0x334   :  { %v121_v34 = vcvt.s32.f32 %v120_v33 }
 0x336   :  { %v125_v37 = vsel %vm123_vm11, %v121_v34, %v124_v35 }
 0x337   :  { %v126_v38 = vsel %vm122_vm12, %v104_v36, %v125_v37 }
 0x338   :  { %127 = vst [vmem:[%s200_s3] sm:$0xff] %v126_v38 }

</bundles_post_ra>
